<compile_context>
chip_gen: v5e
topology: v5e:2x2
jax: 0.10.0
libtpu: 0.0.40
codegen_flags: <defaults>
</compile_context>

<pallas_src>
import jax
import jax.numpy as jnp
from jax.experimental import pallas as pl
from jax.experimental.pallas import tpu as pltpu


def _round_up(x, m):
    return ((x + m - 1) // m) * m


def _autoencoder_kernel(x_ref, we_t_ref, be_ref, wd_t_ref, bd_ref, out_ref):
    # x_ref:    [TB, F]   flattened input tile (one batch block)
    # we_t_ref: [F, Lp]   fc_enc weight, pre-transposed, latent dim zero-padded to Lp
    # be_ref:   [1, Lp]   fc_enc bias (f32, zero-padded)
    # wd_t_ref: [Lp, F]   fc_dec weight, pre-transposed, zero-padded rows
    # bd_ref:   [1, F]    fc_dec bias (f32)
    # out_ref:  [TB, F]   reconstruction tile (flattened)

    # Cast activations to the weight dtype (no-op for f32; bf16 MXU path when
    # params are bf16). Accumulate in f32 either way.
    x = x_ref[...].astype(we_t_ref.dtype)

    # latent = x @ W_enc^T + b_enc     (f32 accumulation, f32 lane-dense bias add)
    latent = jnp.dot(x, we_t_ref[...], preferred_element_type=jnp.float32)
    latent = latent + be_ref[...]                       # [TB, Lp], f32

    # dec = latent @ W_dec^T + b_dec.  Keep the latent in f32 for the second
    # GEMM (no extra activation rounding on the bf16 param path); upcasting the
    # VMEM-resident decoder weight is VPU work hidden under the activation DMA.
    dec = jnp.dot(latent, wd_t_ref[...].astype(jnp.float32),
                  preferred_element_type=jnp.float32)
    dec = dec + bd_ref[...]

    out_ref[...] = dec.astype(out_ref.dtype)


def autoencoder_forward(x, w_enc, b_enc, w_dec, b_dec, *,
                        param_dtype=None, act_dtype=None, block_b=512):
    """x: [B, C, H, W] (NCHW). Returns reconstruction [B, C, H, W].

    param_dtype: optional dtype for the weight matrices inside the kernel
                 (e.g. jnp.bfloat16 to halve weight HBM traffic).
    act_dtype:   optional dtype for activations in/out of the kernel
                 (e.g. jnp.bfloat16 to nearly halve activation HBM traffic —
                 the dominant term for large B). Output has this dtype.
    block_b:     max batch tile size (multiple of 8). Accumulation stays f32.
    """
    B, C, H, W = x.shape
    F = C * H * W
    L = w_enc.shape[0]
    assert w_enc.shape == (L, F)
    assert w_dec.shape == (F, L)
    assert block_b % 8 == 0, "block_b must be a multiple of 8 (sublane constraint)"

    pdt = param_dtype if param_dtype is not None else w_enc.dtype
    adt = act_dtype if act_dtype is not None else x.dtype

    # Lane-pad the latent dim to a multiple of 128: the VMEM layout pads it
    # anyway, so this costs nothing and makes every operand lane-dense.
    Lp = _round_up(L, 128)

    x_flat = x.reshape(B, F).astype(adt)
    we_t = jnp.zeros((F, Lp), pdt).at[:, :L].set(w_enc.T.astype(pdt))          # [F, Lp]
    wd_t = jnp.zeros((Lp, F), pdt).at[:L, :].set(w_dec.T.astype(pdt))          # [Lp, F]
    be = jnp.zeros((1, Lp), jnp.float32).at[:, :L].set(b_enc.astype(jnp.float32))
    bd = b_dec.reshape(1, F).astype(jnp.float32)

    # Guard the "both weights VMEM-resident" design before it silently OOMs
    # (v7x, 64 MiB physical VMEM, hits this wall first as F grows).
    resident_bytes = (we_t.size * we_t.dtype.itemsize
                      + wd_t.size * wd_t.dtype.itemsize
                      + be.size * be.dtype.itemsize
                      + bd.size * bd.dtype.itemsize)
    # TODO(synk): once F grows past ~40K (resident weights > ~24 MiB), add a
    # K-tile over F for the encoder GEMM (extra "arbitrary" grid axis + f32
    # accumulator scratch + pl.when init/finalize) instead of asserting here.
    assert resident_bytes <= 24 * 1024 * 1024, (
        "weights-resident kernel exceeds the VMEM budget; needs K-tiling over F")

    # Batch tile: the whole batch if tiny; otherwise ensure >= 2 grid programs
    # (so the "parallel" axis actually uses both v7x TensorCores) and cap at
    # block_b. TB is always a multiple of 8 or equal to B.
    if B <= 16:
        TB = B
    else:
        TB = min(block_b, _round_up(pl.cdiv(B, 2), 8))
    grid = (pl.cdiv(B, TB),)

    act_itemsize = x_flat.dtype.itemsize
    cost = pl.CostEstimate(
        flops=2 * B * F * L * 2,          # two GEMMs: B*F*L MACs each, 2 flops/MAC
        transcendentals=0,
        bytes_accessed=(x_flat.size * act_itemsize          # activations in
                        + B * F * act_itemsize              # activations out
                        + we_t.size * we_t.dtype.itemsize
                        + wd_t.size * wd_t.dtype.itemsize
                        + be.size * be.dtype.itemsize
                        + bd.size * bd.dtype.itemsize),
    )

    # Constant operands: fetched once, single-buffered (no wasted second copy).
    def _const_spec(shape):
        return pl.BlockSpec(shape, lambda i: (0, 0), pipeline_mode=pl.Buffered(1))

    out_flat = pl.pallas_call(
        _autoencoder_kernel,
        out_shape=jax.ShapeDtypeStruct((B, F), adt),
        grid=grid,
        in_specs=[
            pl.BlockSpec((TB, F), lambda i: (i, 0)),   # activations: streamed per block
            _const_spec((F, Lp)),                      # enc weight: VMEM-resident
            _const_spec((1, Lp)),                      # enc bias:   VMEM-resident
            _const_spec((Lp, F)),                      # dec weight: VMEM-resident
            _const_spec((1, F)),                       # dec bias:   VMEM-resident
        ],
        out_specs=pl.BlockSpec((TB, F), lambda i: (i, 0)),
        compiler_params=pltpu.CompilerParams(
            dimension_semantics=("parallel",),          # shard batch across TCs (v7x)
            vmem_limit_bytes=32 * 1024 * 1024,          # headroom for TB=512 f32 on v5e
        ),
        cost_estimate=cost,
    )(x_flat, we_t, be, wd_t, bd)

    return out_flat.reshape(B, C, H, W)


if __name__ == "__main__":
    # NOTE: B=2 is a correctness smoke test only (grid=(1,), pure launch/DMA
    # overhead) — do not benchmark or tune against this shape; the kernel's
    # perf levers only show up for B in the hundreds+.
    B, C, H, W = 2, 4, 16, 16
    F = C * H * W            # some_flattened_size = 1024
    L = 32                   # latent_dim

    key = jax.random.PRNGKey(0)
    kx, kwe, kbe, kwd, kbd = jax.random.split(key, 5)

    x = jax.random.normal(kx, (B, C, H, W), dtype=jnp.float32)
    # Deterministic synthetic parameters (PyTorch Linear shapes):
    w_enc = jax.random.normal(kwe, (L, F), dtype=jnp.float32) * 0.02   # fc_enc.weight
    b_enc = jax.random.normal(kbe, (L,), dtype=jnp.float32) * 0.02     # fc_enc.bias
    w_dec = jax.random.normal(kwd, (F, L), dtype=jnp.float32) * 0.02   # fc_dec.weight
    b_dec = jax.random.normal(kbd, (F,), dtype=jnp.float32) * 0.02     # fc_dec.bias

    # Pure-JAX reference for the same semantics.
    x_flat = x.reshape(B, F)
    latent_ref = x_flat @ w_enc.T + b_enc
    dec_ref = latent_ref @ w_dec.T + b_dec
    ref = dec_ref.reshape(B, C, H, W)

    # f32 path: matches the PyTorch module's numerics.
    out = autoencoder_forward(x, w_enc, b_enc, w_dec, b_dec)
    out = jax.block_until_ready(out)
    assert out.shape == (B, C, H, W)
    assert jnp.allclose(out, ref, atol=1e-4, rtol=1e-4), "f32 mismatch vs reference"

    # bf16 params + bf16 activations path: nearly halves HBM bytes on the
    # binding resource; accumulation and the latent stay f32 inside the kernel.
    out_bf16 = autoencoder_forward(x, w_enc, b_enc, w_dec, b_dec,
                                   param_dtype=jnp.bfloat16,
                                   act_dtype=jnp.bfloat16)
    out_bf16 = jax.block_until_ready(out_bf16)
    assert out_bf16.shape == (B, C, H, W)
    assert out_bf16.dtype == jnp.bfloat16
    assert jnp.allclose(out_bf16.astype(jnp.float32), ref,
                        atol=5e-2, rtol=5e-2), "bf16 mismatch vs reference"

    print("KERNEL_OK")
</pallas_src>

<mosaic_0001>
module attributes {stable_mosaic.version = 11 : i64} {
  func.func @_autoencoder_kernel(%arg0: i32, %arg1: memref<2x1024xf32, #tpu.memory_space<vmem>>, %arg2: memref<1024x128xf32, #tpu.memory_space<vmem>>, %arg3: memref<1x128xf32, #tpu.memory_space<vmem>>, %arg4: memref<128x1024xf32, #tpu.memory_space<vmem>>, %arg5: memref<1x1024xf32, #tpu.memory_space<vmem>>, %arg6: memref<2x1024xf32, #tpu.memory_space<vmem>>) attributes {dimension_semantics = [#tpu.dimension_semantics<parallel>], iteration_bounds = array<i64: 1>, scalar_prefetch = 0 : i64, scratch_operands = 0 : i64, tpu.core_type = #tpu.core_type<tc>, window_params = [{transform_indices = @transform_0, window_bounds = array<i64: 2, 1024>}, {pipeline_mode = #tpu.pipeline_mode<synchronous>, transform_indices = @transform_1, window_bounds = array<i64: 1024, 128>}, {pipeline_mode = #tpu.pipeline_mode<synchronous>, transform_indices = @transform_2, window_bounds = array<i64: 1, 128>}, {pipeline_mode = #tpu.pipeline_mode<synchronous>, transform_indices = @transform_3, window_bounds = array<i64: 128, 1024>}, {pipeline_mode = #tpu.pipeline_mode<synchronous>, transform_indices = @transform_4, window_bounds = array<i64: 1, 1024>}, {transform_indices = @transform_5, window_bounds = array<i64: 2, 1024>}]} {
    %c0 = arith.constant 0 : index
    %c0_0 = arith.constant 0 : index
    %0 = vector.load %arg1[%c0, %c0_0] : memref<2x1024xf32, #tpu.memory_space<vmem>>, vector<2x1024xf32>
    %c0_1 = arith.constant 0 : index
    %c0_2 = arith.constant 0 : index
    %1 = vector.load %arg2[%c0_1, %c0_2] : memref<1024x128xf32, #tpu.memory_space<vmem>>, vector<1024x128xf32>
    %cst = arith.constant dense<0.000000e+00> : vector<2x128xf32>
    %2 = tpu.matmul %0, %1, %cst {dimension_numbers = #tpu.dot_dimension_numbers<[1], [0], [0], [1], [0, 0, 1, 1], [], []>} : vector<2x1024xf32>, vector<1024x128xf32>, vector<2x128xf32> -> vector<2x128xf32>
    %c0_3 = arith.constant 0 : index
    %c0_4 = arith.constant 0 : index
    %3 = vector.load %arg3[%c0_3, %c0_4] : memref<1x128xf32, #tpu.memory_space<vmem>>, vector<1x128xf32>
    %4 = vector.broadcast %3 : vector<1x128xf32> to vector<2x128xf32>
    %5 = arith.addf %2, %4 : vector<2x128xf32>
    %c0_5 = arith.constant 0 : index
    %c0_6 = arith.constant 0 : index
    %6 = vector.load %arg4[%c0_5, %c0_6] : memref<128x1024xf32, #tpu.memory_space<vmem>>, vector<128x1024xf32>
    %cst_7 = arith.constant dense<0.000000e+00> : vector<2x1024xf32>
    %7 = tpu.matmul %5, %6, %cst_7 {dimension_numbers = #tpu.dot_dimension_numbers<[1], [0], [0], [1], [0, 0, 1, 1], [], []>} : vector<2x128xf32>, vector<128x1024xf32>, vector<2x1024xf32> -> vector<2x1024xf32>
    %c0_8 = arith.constant 0 : index
    %c0_9 = arith.constant 0 : index
    %8 = vector.load %arg5[%c0_8, %c0_9] : memref<1x1024xf32, #tpu.memory_space<vmem>>, vector<1x1024xf32>
    %9 = vector.broadcast %8 : vector<1x1024xf32> to vector<2x1024xf32>
    %10 = arith.addf %7, %9 : vector<2x1024xf32>
    %c0_10 = arith.constant 0 : index
    %c0_11 = arith.constant 0 : index
    %11 = vector.load %arg6[%c0_10, %c0_11] : memref<2x1024xf32, #tpu.memory_space<vmem>>, vector<2x1024xf32>
    tpu.vector_store %arg6[%c0_10, %c0_11], %10 {strides = array<i32>} : memref<2x1024xf32, #tpu.memory_space<vmem>>, vector<2x1024xf32>,
    return
  }
  func.func @transform_0(%arg0: i32) -> (i32, i32) {
    %c0_i32 = arith.constant 0 : i32
    %c0_i32_0 = arith.constant 0 : i32
    return %arg0, %c0_i32 : i32, i32
  }
  func.func @transform_1(%arg0: i32) -> (i32, i32) {
    %c0_i32 = arith.constant 0 : i32
    %c0_i32_0 = arith.constant 0 : i32
    %c0_i32_1 = arith.constant 0 : i32
    return %c0_i32, %c0_i32_0 : i32, i32
  }
  func.func @transform_2(%arg0: i32) -> (i32, i32) {
    %c0_i32 = arith.constant 0 : i32
    %c0_i32_0 = arith.constant 0 : i32
    %c0_i32_1 = arith.constant 0 : i32
    return %c0_i32, %c0_i32_0 : i32, i32
  }
  func.func @transform_3(%arg0: i32) -> (i32, i32) {
    %c0_i32 = arith.constant 0 : i32
    %c0_i32_0 = arith.constant 0 : i32
    %c0_i32_1 = arith.constant 0 : i32
    return %c0_i32, %c0_i32_0 : i32, i32
  }
  func.func @transform_4(%arg0: i32) -> (i32, i32) {
    %c0_i32 = arith.constant 0 : i32
    %c0_i32_0 = arith.constant 0 : i32
    %c0_i32_1 = arith.constant 0 : i32
    return %c0_i32, %c0_i32_0 : i32, i32
  }
  func.func @transform_5(%arg0: i32) -> (i32, i32) {
    %c0_i32 = arith.constant 0 : i32
    %c0_i32_0 = arith.constant 0 : i32
    return %arg0, %c0_i32 : i32, i32
  }
}

</mosaic_0001>

<bundles_post_ra>
// kernel: tpu_custom_call.1
= control target key start
LH: loop header
LB: loop body
LE: loop exit
PB: predicated region body
PF: predicated region fallthrough
CT: control target
= control target key end

     0   :  { %10 = vsyncpa [#allocation3], 0  ;;  %s948_s0 = inlined_call_operand.hbm [shape: f32[2,1024], index: 0, kind: input, shape index: {}]   ;;  %s949_s1 = inlined_call_operand.hbm [shape: f32[1024,128], index: 1, kind: input, shape index: {}]   ;;  %s950_s2 = inlined_call_operand.vmem [shape: f32[1,128], index: 2, kind: input, shape index: {}]   ;;  %s951_s3 = inlined_call_operand.hbm [shape: f32[128,1024], index: 3, kind: input, shape index: {}]   ;;  %s952_s4 = inlined_call_operand.hbm [shape: f32[1,1024], index: 4, kind: input, shape index: {}]   ;;  %s953_s5 = inlined_call_operand.hbm [shape: f32[2,1024], index: 5, kind: output, shape index: {}]  }
   0x1   :  { %11 = vsyncpa [#allocation6], 0 }
   0x2   :  { %12 = vsyncpa [#allocation9], 0  ;;  %s29_s20 = sshll.u32 %s949_s1, 4  ;;  %s30_s20 = int_to_ptr.hbm [resolvable:$true] %s29_s20 }
   0x3   :  { %13 = vsyncpa [#allocation4], 0  ;;  %s885_s21 = smov [#allocation5]   ;;  %s19_s25 = sshll.u32 %s948_s0, 4  ;;  %s20_s25 = int_to_ptr.hbm [resolvable:$true] %s19_s25 }
   0x4   :  { %s31_s22 = sshll.u32 %s885_s21, 4  ;;  %s886_s26 = smov 128   ;;  %s32_s22 = int_to_ptr.vmem [resolvable:$true] %s31_s22 }
   0x5   :  { %s887_s27 = smov 8   ;;  %s888_s28 = smov [#allocation2]  }
   0x6   :  { %37 = dma.hbm_to_vmem [thread:$0]  %s30_s20, 16384, %s32_s22, [#allocation6], %s886_s26, %s886_s26, %s887_s27  }
   0x7   :  { %s21_s29 = sshll.u32 %s888_s28, 4  ;;  %s44_s7 = sshll.u32 %s951_s3, 4  ;;  %s22_s29 = int_to_ptr.vmem [resolvable:$true] %s21_s29  ;;  %s45_s7 = int_to_ptr.hbm [resolvable:$true] %s44_s7 }
   0x8   :  { %24 = dma.hbm_to_vmem [thread:$0]  %s20_s25, 256, %s22_s29, [#allocation3]  }
   0x9   :  { %s889_s1 = smov [#allocation7]   ;;  %s58_s0 = sshll.u32 %s952_s4, 4  ;;  %s59_s0 = int_to_ptr.hbm [resolvable:$true] %s58_s0 }
   0xa   :  { %s46_s8 = sshll.u32 %s889_s1, 4  ;;  %s890_s11 = smov 1024   ;;  %s47_s8 = int_to_ptr.vmem [resolvable:$true] %s46_s8 }
   0xb   :  { %s891_s12 = smov 64   ;;  %s892_s13 = smov [#allocation8]  }
   0xc   :  { %52 = dma.hbm_to_vmem [thread:$0]  %s45_s7, 16384, %s47_s8, [#allocation6], %s890_s11, %s890_s11, %s891_s12  }
   0xd   :  { %s60_s14 = sshll.u32 %s892_s13, 4  ;;  %s61_s14 = int_to_ptr.vmem [resolvable:$true] %s60_s14 }
   0xe   :  { %63 = dma.hbm_to_vmem [thread:$0]  %s59_s0, 128, %s61_s14, [#allocation9]  }
   0xf   :  { %877 = dma.done.wait [#allocation3], 256  }
  0x10   :  { %878 = vsyncadd [#allocation3], 4294967040 }
  0x11   :  { %879 = dma.done.wait [#allocation6], 32768  }
  0x12   :  { %880 = vsyncadd [#allocation6], 4294934528 }
  0x13   :  { %881 = dma.done.wait [#allocation9], 128  }
  0x14   :  { %882 = vsyncadd [#allocation9], 4294967168  ;;  %v129_v0 = vld [vmem:[#allocation5 + $0x178] sm:$0xff]  ;;  %v128_v2 = vld [vmem:[#allocation5 + $0x170] sm:$0xff]  ;;  %vm715_vm0 = vcmask 1041408   ;;  %vm717_vm1 = vcmask 1045508  }
  0x15   :  { %v97_v1 = vld [vmem:[#allocation5 + $0x78] sm:$0xff]  ;;  %275 = vmatpush.msra.mxu2 %v129_v0  ;;  %v96_v4 = vld [vmem:[#allocation5 + $0x70] sm:$0xff]  ;;  %v127_v6 = vld [vmem:[#allocation5 + $0x168] sm:$0xff]  ;;  %vm719_vm2 = vcmask 1043456   ;;  %s735_s18 = sshll.u32 %s953_s5, 4  ;;  %s736_s18 = int_to_ptr.hbm [resolvable:$true] %s735_s18 }
  0x16   :  { %235 = vmatpush.msra.mxu0 %v97_v1  ;;  %v145_v3 = vld [vmem:[#allocation5 + $0x1f8] sm:$0xff]  ;;  %v144_v7 = vld [vmem:[#allocation5 + $0x1f0] sm:$0xff]  ;;  %v95_v8 = vld [vmem:[#allocation5 + $0x68] sm:$0xff] }
  0x17   :  { %v113_v5 = vld [vmem:[#allocation5 + $0xf8] sm:$0xff]  ;;  %295 = vmatpush.msra.mxu3 %v145_v3  ;;  %276 = vmatpush.msra.mxu2 %v128_v2  ;;  %v112_v9 = vld [vmem:[#allocation5 + $0xf0] sm:$0xff]  ;;  %v143_v10 = vld [vmem:[#allocation5 + $0x1e8] sm:$0xff] }
  0x18   :  { %255 = vmatpush.msra.mxu1 %v113_v5  ;;  %236 = vmatpush.msra.mxu0 %v96_v4  ;;  %v126_v11 = vld [vmem:[#allocation5 + $0x160] sm:$0xff]  ;;  %v111_v13 = vld [vmem:[#allocation5 + $0xe8] sm:$0xff]  ;;  %v125_v16 = vld [vmem:[#allocation5 + $0x158] sm:$0xff] }
  0x19   :  { %296 = vmatpush.msra.mxu3 %v144_v7  ;;  %v94_v12 = vld [vmem:[#allocation5 + $0x60] sm:$0xff]  ;;  %277 = vmatpush.msra.mxu2 %v127_v6  ;;  %v93_v17 = vld [vmem:[#allocation5 + $0x58] sm:$0xff]  ;;  %v124_v20 = vld [vmem:[#allocation5 + $0x150] sm:$0xff] }
  0x1a   :  { %256 = vmatpush.msra.mxu1 %v112_v9  ;;  %237 = vmatpush.msra.mxu0 %v95_v8  ;;  %v142_v14 = vld [vmem:[#allocation5 + $0x1e0] sm:$0xff]  ;;  %v141_v18 = vld [vmem:[#allocation5 + $0x1d8] sm:$0xff]  ;;  %v92_v21 = vld [vmem:[#allocation5 + $0x50] sm:$0xff] }
  0x1b   :  { %v110_v15 = vld [vmem:[#allocation5 + $0xe0] sm:$0xff]  ;;  %297 = vmatpush.msra.mxu3 %v143_v10  ;;  %278 = vmatpush.msra.mxu2 %v126_v11  ;;  %v109_v19 = vld [vmem:[#allocation5 + $0xd8] sm:$0xff]  ;;  %v140_v22 = vld [vmem:[#allocation5 + $0x1d0] sm:$0xff] }
  0x1c   :  { %257 = vmatpush.msra.mxu1 %v111_v13  ;;  %238 = vmatpush.msra.mxu0 %v94_v12  ;;  %v108_v23 = vld [vmem:[#allocation5 + $0xd0] sm:$0xff]  ;;  %v123_v24 = vld [vmem:[#allocation5 + $0x148] sm:$0xff]  ;;  %v122_v28 = vld [vmem:[#allocation5 + $0x140] sm:$0xff] }
  0x1d   :  { %298 = vmatpush.msra.mxu3 %v142_v14  ;;  %279 = vmatpush.msra.mxu2 %v125_v16  ;;  %v91_v25 = vld [vmem:[#allocation5 + $0x48] sm:$0xff]  ;;  %v90_v29 = vld [vmem:[#allocation5 + $0x40] sm:$0xff]  ;;  %v121_v32 = vld [vmem:[#allocation5 + $0x138] sm:$0xff] }
  0x1e   :  { %258 = vmatpush.msra.mxu1 %v110_v15  ;;  %239 = vmatpush.msra.mxu0 %v93_v17  ;;  %v139_v26 = vld [vmem:[#allocation5 + $0x1c8] sm:$0xff]  ;;  %v138_v30 = vld [vmem:[#allocation5 + $0x1c0] sm:$0xff]  ;;  %v89_v33 = vld [vmem:[#allocation5 + $0x38] sm:$0xff] }
  0x1f   :  { %299 = vmatpush.msra.mxu3 %v141_v18  ;;  %280 = vmatpush.msra.mxu2 %v124_v20  ;;  %v107_v27 = vld [vmem:[#allocation5 + $0xc8] sm:$0xff]  ;;  %v106_v31 = vld [vmem:[#allocation5 + $0xc0] sm:$0xff]  ;;  %v137_v34 = vld [vmem:[#allocation5 + $0x1b8] sm:$0xff] }
  0x20   :  { %259 = vmatpush.msra.mxu1 %v109_v19  ;;  %240 = vmatpush.msra.mxu0 %v92_v21  ;;  %v105_v35 = vld [vmem:[#allocation5 + $0xb8] sm:$0xff]  ;;  %v120_v36 = vld [vmem:[#allocation5 + $0x130] sm:$0xff]  ;;  %v119_v40 = vld [vmem:[#allocation5 + $0x128] sm:$0xff] }
  0x21   :  { %300 = vmatpush.msra.mxu3 %v140_v22  ;;  %281 = vmatpush.msra.mxu2 %v123_v24  ;;  %v88_v37 = vld [vmem:[#allocation5 + $0x30] sm:$0xff]  ;;  %v87_v41 = vld [vmem:[#allocation5 + $0x28] sm:$0xff]  ;;  %v118_v44 = vld [vmem:[#allocation5 + $0x120] sm:$0xff] }
  0x22   :  { %260 = vmatpush.msra.mxu1 %v108_v23  ;;  %241 = vmatpush.msra.mxu0 %v91_v25  ;;  %v136_v38 = vld [vmem:[#allocation5 + $0x1b0] sm:$0xff]  ;;  %v135_v42 = vld [vmem:[#allocation5 + $0x1a8] sm:$0xff]  ;;  %v86_v45 = vld [vmem:[#allocation5 + $0x20] sm:$0xff] }
  0x23   :  { %301 = vmatpush.msra.mxu3 %v139_v26  ;;  %282 = vmatpush.msra.mxu2 %v122_v28  ;;  %v104_v39 = vld [vmem:[#allocation5 + $0xb0] sm:$0xff]  ;;  %v103_v43 = vld [vmem:[#allocation5 + $0xa8] sm:$0xff]  ;;  %v134_v46 = vld [vmem:[#allocation5 + $0x1a0] sm:$0xff] }
  0x24   :  { %261 = vmatpush.msra.mxu1 %v107_v27  ;;  %242 = vmatpush.msra.mxu0 %v90_v29  ;;  %v102_v47 = vld [vmem:[#allocation5 + $0xa0] sm:$0xff]  ;;  %v117_v48 = vld [vmem:[#allocation5 + $0x118] sm:$0xff]  ;;  %v116_v52 = vld [vmem:[#allocation5 + $0x110] sm:$0xff] }
  0x25   :  { %302 = vmatpush.msra.mxu3 %v138_v30  ;;  %283 = vmatpush.msra.mxu2 %v121_v32  ;;  %v85_v49 = vld [vmem:[#allocation5 + $0x18] sm:$0xff]  ;;  %v84_v53 = vld [vmem:[#allocation5 + $0x10] sm:$0xff]  ;;  %v115_v56 = vld [vmem:[#allocation5 + $0x108] sm:$0xff] }
  0x26   :  { %262 = vmatpush.msra.mxu1 %v106_v31  ;;  %243 = vmatpush.msra.mxu0 %v89_v33  ;;  %v133_v50 = vld [vmem:[#allocation5 + $0x198] sm:$0xff]  ;;  %v132_v54 = vld [vmem:[#allocation5 + $0x190] sm:$0xff]  ;;  %v83_v57 = vld [vmem:[#allocation5 + $0x8] sm:$0xff] }
  0x27   :  { %303 = vmatpush.msra.mxu3 %v137_v34  ;;  %284 = vmatpush.msra.mxu2 %v120_v36  ;;  %v101_v51 = vld [vmem:[#allocation5 + $0x98] sm:$0xff]  ;;  %v100_v55 = vld [vmem:[#allocation5 + $0x90] sm:$0xff]  ;;  %v131_v58 = vld [vmem:[#allocation5 + $0x188] sm:$0xff] }
  0x28   :  { %263 = vmatpush.msra.mxu1 %v105_v35  ;;  %244 = vmatpush.msra.mxu0 %v88_v37  ;;  %v99_v59 = vld [vmem:[#allocation5 + $0x88] sm:$0xff]  ;;  %v114_v60 = vld [vmem:[#allocation5 + $0x100] sm:$0xff]  ;;  %v193_v62 = vld [vmem:[#allocation5 + $0x378] sm:$0xff] }
  0x29   :  { %304 = vmatpush.msra.mxu3 %v136_v38  ;;  %285 = vmatpush.msra.mxu2 %v119_v40  ;;  %v82_v61 = vld [vmem:[#allocation5] sm:$0xff]  ;;  %v161_v0 = vld [vmem:[#allocation5 + $0x278] sm:$0xff]  ;;  %v192_v2 = vld [vmem:[#allocation5 + $0x370] sm:$0xff] }
  0x2a   :  { %264 = vmatpush.msra.mxu1 %v104_v39  ;;  %245 = vmatpush.msra.mxu0 %v87_v41  ;;  %v130_v63 = vld [vmem:[#allocation5 + $0x180] sm:$0xff]  ;;  %v209_v1 = vld [vmem:[#allocation5 + $0x3f8] sm:$0xff]  ;;  %v160_v4 = vld [vmem:[#allocation5 + $0x270] sm:$0xff] }
  0x2b   :  { %305 = vmatpush.msra.mxu3 %v135_v42  ;;  %286 = vmatpush.msra.mxu2 %v118_v44  ;;  %v98_v3 = vld [vmem:[#allocation5 + $0x80] sm:$0xff]  ;;  %v177_v5 = vld [vmem:[#allocation5 + $0x2f8] sm:$0xff]  ;;  %v191_v6 = vld [vmem:[#allocation5 + $0x368] sm:$0xff] }
  0x2c   :  { %265 = vmatpush.msra.mxu1 %v103_v43  ;;  %246 = vmatpush.msra.mxu0 %v86_v45  ;;  %v208_v7 = vld [vmem:[#allocation5 + $0x3f0] sm:$0xff]  ;;  %v159_v8 = vld [vmem:[#allocation5 + $0x268] sm:$0xff]  ;;  %v190_v10 = vld [vmem:[#allocation5 + $0x360] sm:$0xff] }
  0x2d   :  { %306 = vmatpush.msra.mxu3 %v134_v46  ;;  %287 = vmatpush.msra.mxu2 %v117_v48  ;;  %v176_v9 = vld [vmem:[#allocation5 + $0x2f0] sm:$0xff]  ;;  %v207_v11 = vld [vmem:[#allocation5 + $0x3e8] sm:$0xff]  ;;  %v158_v12 = vld [vmem:[#allocation5 + $0x260] sm:$0xff] }
  0x2e   :  { %266 = vmatpush.msra.mxu1 %v102_v47  ;;  %247 = vmatpush.msra.mxu0 %v85_v49  ;;  %v175_v13 = vld [vmem:[#allocation5 + $0x2e8] sm:$0xff]  ;;  %v80_v14 = vld [vmem:[#allocation2] sm:$0xff]  ;;  %v189_v15 = vld [vmem:[#allocation5 + $0x358] sm:$0xff] }
  0x2f   :  { %307 = vmatpush.msra.mxu3 %v133_v50  ;;  %288 = vmatpush.msra.mxu2 %v116_v52  ;;  %v206_v16 = vld [vmem:[#allocation5 + $0x3e0] sm:$0xff]  ;;  %216 = vst [vmem:[#allocation1] ss:$4 sm:$0xff] %v80_v14  ;;  %v157_v17 = vld [vmem:[#allocation5 + $0x258] sm:$0xff]  ;;  %v188_v19 = vld [vmem:[#allocation5 + $0x350] sm:$0xff] }
  0x30   :  { %267 = vmatpush.msra.mxu1 %v101_v51  ;;  %248 = vmatpush.msra.mxu0 %v84_v53  ;;  %v174_v18 = vld [vmem:[#allocation5 + $0x2e0] sm:$0xff]  ;;  %v205_v20 = vld [vmem:[#allocation5 + $0x3d8] sm:$0xff]  ;;  %v156_v21 = vld [vmem:[#allocation5 + $0x250] sm:$0xff] }
  0x31   :  { %308 = vmatpush.msra.mxu3 %v132_v54  ;;  %289 = vmatpush.msra.mxu2 %v115_v56  ;;  %v173_v22 = vld [vmem:[#allocation5 + $0x2d8] sm:$0xff]  ;;  %v187_v23 = vld [vmem:[#allocation5 + $0x348] sm:$0xff]  ;;  %v204_v24 = vld [vmem:[#allocation5 + $0x3d0] sm:$0xff] }
  0x32   :  { %268 = vmatpush.msra.mxu1 %v100_v55  ;;  %249 = vmatpush.msra.mxu0 %v83_v57  ;;  %v81_v25 = vld [vmem:[#allocation2 + $0x8] sm:$0xff]  ;;  %v155_v26 = vld [vmem:[#allocation5 + $0x248] sm:$0xff]  ;;  %v172_v27 = vld [vmem:[#allocation5 + $0x2d0] sm:$0xff] }
  0x33   :  { %309 = vmatpush.msra.mxu3 %v131_v58  ;;  %290 = vmatpush.msra.mxu2 %v114_v60  ;;  %218 = vst [vmem:[#allocation1 + $0x20] ss:$4 sm:$0xff] %v81_v25  ;;  %v186_v28 = vld [vmem:[#allocation5 + $0x340] sm:$0xff]  ;;  %v203_v29 = vld [vmem:[#allocation5 + $0x3c8] sm:$0xff]  ;;  %v185_v32 = vld [vmem:[#allocation5 + $0x338] sm:$0xff] }
  0x34   :  { %269 = vmatpush.msra.mxu1 %v99_v59  ;;  %250 = vmatpush.msra.mxu0 %v82_v61  ;;  %v154_v30 = vld [vmem:[#allocation5 + $0x240] sm:$0xff]  ;;  %v171_v31 = vld [vmem:[#allocation5 + $0x2c8] sm:$0xff]  ;;  %v153_v34 = vld [vmem:[#allocation5 + $0x238] sm:$0xff] }
  0x35   :  { %355 = vmatpush.msrb.mxu2 %v193_v62  ;;  %310 = vmatpush.msra.mxu3 %v130_v63  ;;  %v202_v33 = vld [vmem:[#allocation5 + $0x3c0] sm:$0xff]  ;;  %v184_v36 = vld [vmem:[#allocation5 + $0x330] sm:$0xff]  ;;  %v201_v37 = vld [vmem:[#allocation5 + $0x3b8] sm:$0xff] }
  0x36   :  { %315 = vmatpush.msrb.mxu0 %v161_v0  ;;  %270 = vmatpush.msra.mxu1 %v98_v3  ;;  %v170_v35 = vld [vmem:[#allocation5 + $0x2c0] sm:$0xff]  ;;  %v152_v38 = vld [vmem:[#allocation5 + $0x230] sm:$0xff]  ;;  %v169_v39 = vld [vmem:[#allocation5 + $0x2b8] sm:$0xff] }
  0x37   :  { %375 = vmatpush.msrb.mxu3 %v209_v1  ;;  %356 = vmatpush.msrb.mxu2 %v192_v2  ;;  %v183_v40 = vld [vmem:[#allocation5 + $0x328] sm:$0xff]  ;;  %v200_v41 = vld [vmem:[#allocation5 + $0x3b0] sm:$0xff]  ;;  %v182_v44 = vld [vmem:[#allocation5 + $0x320] sm:$0xff] }
  0x38   :  { %316 = vmatpush.msrb.mxu0 %v160_v4  ;;  %335 = vmatpush.msrb.mxu1 %v177_v5  ;;  %v151_v42 = vld [vmem:[#allocation5 + $0x228] sm:$0xff]  ;;  %v168_v43 = vld [vmem:[#allocation5 + $0x2b0] sm:$0xff]  ;;  %v221_v46 = vld.sshfl [vmem:[#allocation1 + $0x10] sm:$0xff pattern:$0x73625140] }
  0x39   :  { %357 = vmatpush.msrb.mxu2 %v191_v6  ;;  %376 = vmatpush.msrb.mxu3 %v208_v7  ;;  %v199_v45 = vld [vmem:[#allocation5 + $0x3a8] sm:$0xff]  ;;  %v150_v47 = vld [vmem:[#allocation5 + $0x220] sm:$0xff]  ;;  %v181_v49 = vld [vmem:[#allocation5 + $0x318] sm:$0xff] }
  0x3a   :  { %317 = vmatpush.msrb.mxu0 %v159_v8  ;;  %336 = vmatpush.msrb.mxu1 %v176_v9  ;;  %v167_v48 = vld [vmem:[#allocation5 + $0x2a8] sm:$0xff]  ;;  %v198_v50 = vld [vmem:[#allocation5 + $0x3a0] sm:$0xff]  ;;  %v149_v53 = vld [vmem:[#allocation5 + $0x218] sm:$0xff] }
  0x3b   :  { %358 = vmatpush.msrb.mxu2 %v190_v10  ;;  %377 = vmatpush.msrb.mxu3 %v207_v11  ;;  %v219_v51 = vld.sshfl [vmem:[#allocation1] sm:$0xff pattern:$0x73625140]  ;;  %v222_v52 = vld.sshfl [vmem:[#allocation1 + $0x18] sm:$0xff pattern:$0x73625140] }
  0x3c   :  { %318 = vmatpush.msrb.mxu0 %v158_v12  ;;  %337 = vmatpush.msrb.mxu1 %v175_v13  ;;  %v166_v54 = vld [vmem:[#allocation5 + $0x2a0] sm:$0xff]  ;;  %v180_v55 = vld [vmem:[#allocation5 + $0x310] sm:$0xff]  ;;  %v197_v56 = vld [vmem:[#allocation5 + $0x398] sm:$0xff] }
  0x3d   :  { %359 = vmatpush.msrb.mxu2 %v189_v15  ;;  %378 = vmatpush.msrb.mxu3 %v206_v16  ;;  %v220_v57 = vld.sshfl [vmem:[#allocation1 + $0x8] sm:$0xff pattern:$0x73625140]  ;;  %v165_v59 = vld [vmem:[#allocation5 + $0x298] sm:$0xff]  ;;  %v179_v60 = vld [vmem:[#allocation5 + $0x308] sm:$0xff] }
  0x3e   :  { %319 = vmatpush.msrb.mxu0 %v157_v17  ;;  %338 = vmatpush.msrb.mxu1 %v174_v18  ;;  %v148_v58 = vld [vmem:[#allocation5 + $0x210] sm:$0xff]  ;;  %v147_v62 = vld [vmem:[#allocation5 + $0x208] sm:$0xff]  ;;  %v178_v0 = vld [vmem:[#allocation5 + $0x300] sm:$0xff] }
  0x3f   :  { %360 = vmatpush.msrb.mxu2 %v188_v19  ;;  %379 = vmatpush.msrb.mxu3 %v205_v20  ;;  %v196_v61 = vld [vmem:[#allocation5 + $0x390] sm:$0xff]  ;;  %v195_v1 = vld [vmem:[#allocation5 + $0x388] sm:$0xff]  ;;  %v225_v2 = vld.sshfl [vmem:[#allocation1 + $0x30] sm:$0xff pattern:$0x73625140] }
  0x40   :  { %320 = vmatpush.msrb.mxu0 %v156_v21  ;;  %339 = vmatpush.msrb.mxu1 %v173_v22  ;;  %v164_v63 = vld [vmem:[#allocation5 + $0x290] sm:$0xff]  ;;  %v146_v3 = vld [vmem:[#allocation5 + $0x200] sm:$0xff]  ;;  %v163_v4 = vld [vmem:[#allocation5 + $0x288] sm:$0xff] }
  0x41   :  { %361 = vmatpush.msrb.mxu2 %v187_v23  ;;  %380 = vmatpush.msrb.mxu3 %v204_v24  ;;  %v194_v5 = vld [vmem:[#allocation5 + $0x380] sm:$0xff]  ;;  %v223_v6 = vld.sshfl [vmem:[#allocation1 + $0x20] sm:$0xff pattern:$0x73625140]  ;;  %v517_v11 = vld [vmem:[#allocation7 + $0x3d0] sm:$0xff] }
  0x42   :  { %321 = vmatpush.msrb.mxu0 %v155_v26  ;;  %340 = vmatpush.msrb.mxu1 %v172_v27  ;;  %v226_v7 = vld.sshfl [vmem:[#allocation1 + $0x38] sm:$0xff pattern:$0x73625140]  ;;  %v224_v10 = vld.sshfl [vmem:[#allocation1 + $0x28] sm:$0xff pattern:$0x73625140] }
  0x43   :  { %362 = vmatpush.msrb.mxu2 %v186_v28  ;;  %381 = vmatpush.msrb.mxu3 %v203_v29  ;;  %v162_v8 = vld [vmem:[#allocation5 + $0x280] sm:$0xff]  ;;  %v516_v12 = vld [vmem:[#allocation7 + $0x3c8] sm:$0xff]  ;;  %v518_v13 = vld [vmem:[#allocation7 + $0x3d8] sm:$0xff] }
  0x44   :  { %322 = vmatpush.msrb.mxu0 %v154_v30  ;;  %341 = vmatpush.msrb.mxu1 %v171_v31  ;;  %v515_v9 = vld [vmem:[#allocation7 + $0x3c0] sm:$0xff]  ;;  %v509_v15 = vld [vmem:[#allocation7 + $0x390] sm:$0xff]  ;;  %v508_v16 = vld [vmem:[#allocation7 + $0x388] sm:$0xff] }
  0x45   :  { %363 = vmatpush.msrb.mxu2 %v185_v32  ;;  %382 = vmatpush.msrb.mxu3 %v202_v33  ;;  %v507_v14 = vld [vmem:[#allocation7 + $0x380] sm:$0xff]  ;;  %v510_v17 = vld [vmem:[#allocation7 + $0x398] sm:$0xff]  ;;  %v501_v19 = vld [vmem:[#allocation7 + $0x350] sm:$0xff] }
  0x46   :  { %323 = vmatpush.msrb.mxu0 %v153_v34  ;;  %342 = vmatpush.msrb.mxu1 %v170_v35  ;;  %v499_v18 = vld [vmem:[#allocation7 + $0x340] sm:$0xff]  ;;  %v500_v20 = vld [vmem:[#allocation7 + $0x348] sm:$0xff]  ;;  %v502_v21 = vld [vmem:[#allocation7 + $0x358] sm:$0xff] }
  0x47   :  { %364 = vmatpush.msrb.mxu2 %v184_v36  ;;  %383 = vmatpush.msrb.mxu3 %v201_v37  ;;  %v491_v22 = vld [vmem:[#allocation7 + $0x300] sm:$0xff]  ;;  %v493_v23 = vld [vmem:[#allocation7 + $0x310] sm:$0xff]  ;;  %v492_v24 = vld [vmem:[#allocation7 + $0x308] sm:$0xff] }
  0x48   :  { %324 = vmatpush.msrb.mxu0 %v152_v38  ;;  %343 = vmatpush.msrb.mxu1 %v169_v39  ;;  %v494_v25 = vld [vmem:[#allocation7 + $0x318] sm:$0xff]  ;;  %v483_v26 = vld [vmem:[#allocation7 + $0x2c0] sm:$0xff]  ;;  %v485_v27 = vld [vmem:[#allocation7 + $0x2d0] sm:$0xff] }
  0x49   :  { %365 = vmatpush.msrb.mxu2 %v183_v40  ;;  %384 = vmatpush.msrb.mxu3 %v200_v41  ;;  %v484_v28 = vld [vmem:[#allocation7 + $0x2c8] sm:$0xff]  ;;  %v486_v29 = vld [vmem:[#allocation7 + $0x2d8] sm:$0xff]  ;;  %v475_v30 = vld [vmem:[#allocation7 + $0x280] sm:$0xff] }
  0x4a   :  { %325 = vmatpush.msrb.mxu0 %v151_v42  ;;  %344 = vmatpush.msrb.mxu1 %v168_v43  ;;  %v477_v31 = vld [vmem:[#allocation7 + $0x290] sm:$0xff]  ;;  %v476_v32 = vld [vmem:[#allocation7 + $0x288] sm:$0xff]  ;;  %v478_v33 = vld [vmem:[#allocation7 + $0x298] sm:$0xff] }
  0x4b   :  { %366 = vmatpush.msrb.mxu2 %v182_v44  ;;  %385 = vmatpush.msrb.mxu3 %v199_v45  ;;  %v467_v34 = vld [vmem:[#allocation7 + $0x240] sm:$0xff]  ;;  %v469_v35 = vld [vmem:[#allocation7 + $0x250] sm:$0xff]  ;;  %v468_v36 = vld [vmem:[#allocation7 + $0x248] sm:$0xff] }
  0x4c   :  { %291 = vmatmul.f32.vlgmr.msra.gmra.mxu2 %v221_v46  ;;  %326 = vmatpush.msrb.mxu0 %v150_v47  ;;  %v470_v37 = vld [vmem:[#allocation7 + $0x258] sm:$0xff]  ;;  %v459_v38 = vld [vmem:[#allocation7 + $0x200] sm:$0xff]  ;;  %v461_v39 = vld [vmem:[#allocation7 + $0x210] sm:$0xff] }
  0x4d   :  { %345 = vmatpush.msrb.mxu1 %v167_v48  ;;  %367 = vmatpush.msrb.mxu2 %v181_v49  ;;  %v460_v40 = vld [vmem:[#allocation7 + $0x208] sm:$0xff]  ;;  %v462_v41 = vld [vmem:[#allocation7 + $0x218] sm:$0xff]  ;;  %v451_v42 = vld [vmem:[#allocation7 + $0x1c0] sm:$0xff] }
  0x4e   :  { %386 = vmatpush.msrb.mxu3 %v198_v50  ;;  %251 = vmatmul.f32.vlgmr.msra.gmra.mxu0 %v219_v51  ;;  %v453_v43 = vld [vmem:[#allocation7 + $0x1d0] sm:$0xff]  ;;  %v452_v44 = vld [vmem:[#allocation7 + $0x1c8] sm:$0xff]  ;;  %v454_v45 = vld [vmem:[#allocation7 + $0x1d8] sm:$0xff] }
  0x4f   :  { %311 = vmatmul.f32.vlgmr.msra.gmra.mxu3 %v222_v52  ;;  %327 = vmatpush.msrb.mxu0 %v149_v53  ;;  %v443_v46 = vld [vmem:[#allocation7 + $0x180] sm:$0xff]  ;;  %v445_v47 = vld [vmem:[#allocation7 + $0x190] sm:$0xff]  ;;  %v444_v48 = vld [vmem:[#allocation7 + $0x188] sm:$0xff] }
  0x50   :  { %346 = vmatpush.msrb.mxu1 %v166_v54  ;;  %368 = vmatpush.msrb.mxu2 %v180_v55  ;;  %v446_v49 = vld [vmem:[#allocation7 + $0x198] sm:$0xff]  ;;  %v435_v50 = vld [vmem:[#allocation7 + $0x140] sm:$0xff]  ;;  %v437_v51 = vld [vmem:[#allocation7 + $0x150] sm:$0xff] }
  0x51   :  { %387 = vmatpush.msrb.mxu3 %v197_v56  ;;  %271 = vmatmul.f32.vlgmr.msra.gmra.mxu1 %v220_v57  ;;  %v436_v52 = vld [vmem:[#allocation7 + $0x148] sm:$0xff]  ;;  %v438_v53 = vld [vmem:[#allocation7 + $0x158] sm:$0xff]  ;;  %v427_v54 = vld [vmem:[#allocation7 + $0x100] sm:$0xff] }
  0x52   :  { %328 = vmatpush.msrb.mxu0 %v148_v58  ;;  %347 = vmatpush.msrb.mxu1 %v165_v59  ;;  %v429_v55 = vld [vmem:[#allocation7 + $0x110] sm:$0xff]  ;;  %v428_v56 = vld [vmem:[#allocation7 + $0x108] sm:$0xff]  ;;  %v430_v57 = vld [vmem:[#allocation7 + $0x118] sm:$0xff] }
  0x53   :  { %369 = vmatpush.msrb.mxu2 %v179_v60  ;;  %388 = vmatpush.msrb.mxu3 %v196_v61  ;;  %v419_v58 = vld [vmem:[#allocation7 + $0xc0] sm:$0xff]  ;;  %v421_v59 = vld [vmem:[#allocation7 + $0xd0] sm:$0xff]  ;;  %v420_v60 = vld [vmem:[#allocation7 + $0xc8] sm:$0xff] }
  0x54   :  { %329 = vmatpush.msrb.mxu0 %v147_v62  ;;  %348 = vmatpush.msrb.mxu1 %v164_v63  ;;  %v422_v61 = vld [vmem:[#allocation7 + $0xd8] sm:$0xff]  ;;  %v411_v62 = vld [vmem:[#allocation7 + $0x80] sm:$0xff]  ;;  %v413_v63 = vld [vmem:[#allocation7 + $0x90] sm:$0xff] }
  0x55   :  { %370 = vmatpush.msrb.mxu2 %v178_v0  ;;  %389 = vmatpush.msrb.mxu3 %v195_v1  ;;  %v412_v0 = vld [vmem:[#allocation7 + $0x88] sm:$0xff]  ;;  %v414_v1 = vld [vmem:[#allocation7 + $0x98] sm:$0xff] }
  0x56   :  { %371 = vmatmul.f32.vlgmr.msrb.gmra.mxu2 %v225_v2  ;;  %330 = vmatpush.msrb.mxu0 %v146_v3  ;;  %v403_v2 = vld [vmem:[#allocation7 + $0x40] sm:$0xff]  ;;  %v405_v3 = vld [vmem:[#allocation7 + $0x50] sm:$0xff] }
  0x57   :  { %349 = vmatpush.msrb.mxu1 %v163_v4  ;;  %390 = vmatpush.msrb.mxu3 %v194_v5  ;;  %v404_v4 = vld [vmem:[#allocation7 + $0x48] sm:$0xff]  ;;  %v406_v5 = vld [vmem:[#allocation7 + $0x58] sm:$0xff] }
  0x58   :  { %331 = vmatmul.f32.vlgmr.msrb.gmra.mxu0 %v223_v6  ;;  %391 = vmatmul.f32.vlgmr.msrb.gmra.mxu3 %v226_v7  ;;  %v395_v6 = vld [vmem:[#allocation7] sm:$0xff]  ;;  %v397_v7 = vld [vmem:[#allocation7 + $0x10] sm:$0xff] }
  0x59   :  { %350 = vmatpush.msrb.mxu1 %v162_v8  ;;  %541 = vmatpush.msra.mxu0 %v515_v9  ;;  %v396_v8 = vld [vmem:[#allocation7 + $0x8] sm:$0xff]  ;;  %v398_v9 = vld [vmem:[#allocation7 + $0x18] sm:$0xff] }
  0x5a   :  { %351 = vmatmul.f32.vlgmr.msrb.gmra.mxu1 %v224_v10  ;;  %581 = vmatpush.msra.mxu2 %v517_v11  ;;  %v519_v10 = vld [vmem:[#allocation7 + $0x3e0] sm:$0xff]  ;;  %v520_v11 = vld [vmem:[#allocation7 + $0x3e8] sm:$0xff] }
  0x5b   :  { %561 = vmatpush.msra.mxu1 %v516_v12  ;;  %601 = vmatpush.msra.mxu3 %v518_v13  ;;  %v521_v12 = vld [vmem:[#allocation7 + $0x3f0] sm:$0xff]  ;;  %v522_v13 = vld [vmem:[#allocation7 + $0x3f8] sm:$0xff] }
  0x5c   :  { %542 = vmatpush.msra.mxu0 %v507_v14  ;;  %582 = vmatpush.msra.mxu2 %v509_v15  ;;  %v511_v14 = vld [vmem:[#allocation7 + $0x3a0] sm:$0xff]  ;;  %v512_v15 = vld [vmem:[#allocation7 + $0x3a8] sm:$0xff] }
  0x5d   :  { %562 = vmatpush.msra.mxu1 %v508_v16  ;;  %602 = vmatpush.msra.mxu3 %v510_v17  ;;  %v513_v16 = vld [vmem:[#allocation7 + $0x3b0] sm:$0xff]  ;;  %v514_v17 = vld [vmem:[#allocation7 + $0x3b8] sm:$0xff] }
  0x5e   :  { %543 = vmatpush.msra.mxu0 %v499_v18  ;;  %583 = vmatpush.msra.mxu2 %v501_v19  ;;  %v503_v18 = vld [vmem:[#allocation7 + $0x360] sm:$0xff]  ;;  %v504_v19 = vld [vmem:[#allocation7 + $0x368] sm:$0xff] }
  0x5f   :  { %563 = vmatpush.msra.mxu1 %v500_v20  ;;  %603 = vmatpush.msra.mxu3 %v502_v21  ;;  %v505_v20 = vld [vmem:[#allocation7 + $0x370] sm:$0xff]  ;;  %v506_v21 = vld [vmem:[#allocation7 + $0x378] sm:$0xff] }
  0x60   :  { %544 = vmatpush.msra.mxu0 %v491_v22  ;;  %584 = vmatpush.msra.mxu2 %v493_v23  ;;  %v495_v22 = vld [vmem:[#allocation7 + $0x320] sm:$0xff]  ;;  %v496_v23 = vld [vmem:[#allocation7 + $0x328] sm:$0xff] }
  0x61   :  { %564 = vmatpush.msra.mxu1 %v492_v24  ;;  %604 = vmatpush.msra.mxu3 %v494_v25  ;;  %v497_v24 = vld [vmem:[#allocation7 + $0x330] sm:$0xff]  ;;  %v498_v25 = vld [vmem:[#allocation7 + $0x338] sm:$0xff] }
  0x62   :  { %545 = vmatpush.msra.mxu0 %v483_v26  ;;  %585 = vmatpush.msra.mxu2 %v485_v27  ;;  %v487_v26 = vld [vmem:[#allocation7 + $0x2e0] sm:$0xff]  ;;  %v488_v27 = vld [vmem:[#allocation7 + $0x2e8] sm:$0xff] }
  0x63   :  { %565 = vmatpush.msra.mxu1 %v484_v28  ;;  %605 = vmatpush.msra.mxu3 %v486_v29  ;;  %v489_v28 = vld [vmem:[#allocation7 + $0x2f0] sm:$0xff]  ;;  %v490_v29 = vld [vmem:[#allocation7 + $0x2f8] sm:$0xff] }
  0x64   :  { %546 = vmatpush.msra.mxu0 %v475_v30  ;;  %586 = vmatpush.msra.mxu2 %v477_v31  ;;  %v479_v30 = vld [vmem:[#allocation7 + $0x2a0] sm:$0xff]  ;;  %v480_v31 = vld [vmem:[#allocation7 + $0x2a8] sm:$0xff] }
  0x65   :  { %566 = vmatpush.msra.mxu1 %v476_v32  ;;  %606 = vmatpush.msra.mxu3 %v478_v33  ;;  %v481_v32 = vld [vmem:[#allocation7 + $0x2b0] sm:$0xff]  ;;  %v482_v33 = vld [vmem:[#allocation7 + $0x2b8] sm:$0xff] }
  0x66   :  { %547 = vmatpush.msra.mxu0 %v467_v34  ;;  %587 = vmatpush.msra.mxu2 %v469_v35  ;;  %v471_v34 = vld [vmem:[#allocation7 + $0x260] sm:$0xff]  ;;  %v472_v35 = vld [vmem:[#allocation7 + $0x268] sm:$0xff] }
  0x67   :  { %567 = vmatpush.msra.mxu1 %v468_v36  ;;  %607 = vmatpush.msra.mxu3 %v470_v37  ;;  %v473_v36 = vld [vmem:[#allocation7 + $0x270] sm:$0xff]  ;;  %v474_v37 = vld [vmem:[#allocation7 + $0x278] sm:$0xff] }
  0x68   :  { %548 = vmatpush.msra.mxu0 %v459_v38  ;;  %588 = vmatpush.msra.mxu2 %v461_v39  ;;  %v463_v38 = vld [vmem:[#allocation7 + $0x220] sm:$0xff]  ;;  %v464_v39 = vld [vmem:[#allocation7 + $0x228] sm:$0xff] }
  0x69   :  { %568 = vmatpush.msra.mxu1 %v460_v40  ;;  %608 = vmatpush.msra.mxu3 %v462_v41  ;;  %v465_v40 = vld [vmem:[#allocation7 + $0x230] sm:$0xff]  ;;  %v466_v41 = vld [vmem:[#allocation7 + $0x238] sm:$0xff] }
  0x6a   :  { %549 = vmatpush.msra.mxu0 %v451_v42  ;;  %589 = vmatpush.msra.mxu2 %v453_v43  ;;  %v455_v42 = vld [vmem:[#allocation7 + $0x1e0] sm:$0xff]  ;;  %v456_v43 = vld [vmem:[#allocation7 + $0x1e8] sm:$0xff] }
  0x6b   :  { %569 = vmatpush.msra.mxu1 %v452_v44  ;;  %609 = vmatpush.msra.mxu3 %v454_v45  ;;  %v457_v44 = vld [vmem:[#allocation7 + $0x1f0] sm:$0xff]  ;;  %v458_v45 = vld [vmem:[#allocation7 + $0x1f8] sm:$0xff] }
  0x6c   :  { %550 = vmatpush.msra.mxu0 %v443_v46  ;;  %590 = vmatpush.msra.mxu2 %v445_v47  ;;  %v447_v46 = vld [vmem:[#allocation7 + $0x1a0] sm:$0xff]  ;;  %v448_v47 = vld [vmem:[#allocation7 + $0x1a8] sm:$0xff] }
  0x6d   :  { %570 = vmatpush.msra.mxu1 %v444_v48  ;;  %610 = vmatpush.msra.mxu3 %v446_v49  ;;  %v449_v48 = vld [vmem:[#allocation7 + $0x1b0] sm:$0xff]  ;;  %v450_v49 = vld [vmem:[#allocation7 + $0x1b8] sm:$0xff] }
  0x6e   :  { %551 = vmatpush.msra.mxu0 %v435_v50  ;;  %591 = vmatpush.msra.mxu2 %v437_v51  ;;  %v439_v50 = vld [vmem:[#allocation7 + $0x160] sm:$0xff]  ;;  %v440_v51 = vld [vmem:[#allocation7 + $0x168] sm:$0xff] }
  0x6f   :  { %571 = vmatpush.msra.mxu1 %v436_v52  ;;  %611 = vmatpush.msra.mxu3 %v438_v53  ;;  %v441_v52 = vld [vmem:[#allocation7 + $0x170] sm:$0xff]  ;;  %v442_v53 = vld [vmem:[#allocation7 + $0x178] sm:$0xff] }
  0x70   :  { %552 = vmatpush.msra.mxu0 %v427_v54  ;;  %592 = vmatpush.msra.mxu2 %v429_v55  ;;  %v431_v54 = vld [vmem:[#allocation7 + $0x120] sm:$0xff]  ;;  %v432_v55 = vld [vmem:[#allocation7 + $0x128] sm:$0xff] }
  0x71   :  { %572 = vmatpush.msra.mxu1 %v428_v56  ;;  %612 = vmatpush.msra.mxu3 %v430_v57  ;;  %v433_v56 = vld [vmem:[#allocation7 + $0x130] sm:$0xff]  ;;  %v434_v57 = vld [vmem:[#allocation7 + $0x138] sm:$0xff] }
  0x72   :  { %553 = vmatpush.msra.mxu0 %v419_v58  ;;  %593 = vmatpush.msra.mxu2 %v421_v59  ;;  %v423_v58 = vld [vmem:[#allocation7 + $0xe0] sm:$0xff]  ;;  %v424_v59 = vld [vmem:[#allocation7 + $0xe8] sm:$0xff] }
  0x73   :  { %573 = vmatpush.msra.mxu1 %v420_v60  ;;  %613 = vmatpush.msra.mxu3 %v422_v61  ;;  %v425_v60 = vld [vmem:[#allocation7 + $0xf0] sm:$0xff]  ;;  %v426_v61 = vld [vmem:[#allocation7 + $0xf8] sm:$0xff] }
  0x74   :  { %554 = vmatpush.msra.mxu0 %v411_v62  ;;  %594 = vmatpush.msra.mxu2 %v413_v63  ;;  %v415_v62 = vld [vmem:[#allocation7 + $0xa0] sm:$0xff]  ;;  %v416_v63 = vld [vmem:[#allocation7 + $0xa8] sm:$0xff] }
  0x75   :  { %574 = vmatpush.msra.mxu1 %v412_v0  ;;  %614 = vmatpush.msra.mxu3 %v414_v1  ;;  %v417_v0 = vld [vmem:[#allocation7 + $0xb0] sm:$0xff]  ;;  %v418_v1 = vld [vmem:[#allocation7 + $0xb8] sm:$0xff] }
  0x76   :  { %555 = vmatpush.msra.mxu0 %v403_v2  ;;  %595 = vmatpush.msra.mxu2 %v405_v3  ;;  %v407_v2 = vld [vmem:[#allocation7 + $0x60] sm:$0xff]  ;;  %v408_v3 = vld [vmem:[#allocation7 + $0x68] sm:$0xff] }
  0x77   :  { %575 = vmatpush.msra.mxu1 %v404_v4  ;;  %615 = vmatpush.msra.mxu3 %v406_v5  ;;  %v409_v4 = vld [vmem:[#allocation7 + $0x70] sm:$0xff]  ;;  %v410_v5 = vld [vmem:[#allocation7 + $0x78] sm:$0xff] }
  0x78   :  { %556 = vmatpush.msra.mxu0 %v395_v6  ;;  %596 = vmatpush.msra.mxu2 %v397_v7  ;;  %v399_v6 = vld [vmem:[#allocation7 + $0x20] sm:$0xff]  ;;  %v400_v7 = vld [vmem:[#allocation7 + $0x28] sm:$0xff] }
  0x79   :  { %576 = vmatpush.msra.mxu1 %v396_v8  ;;  %616 = vmatpush.msra.mxu3 %v398_v9  ;;  %v401_v8 = vld [vmem:[#allocation7 + $0x30] sm:$0xff]  ;;  %v402_v9 = vld [vmem:[#allocation7 + $0x38] sm:$0xff] }
  0x7a   :  { %621 = vmatpush.msrb.mxu0 %v519_v10  ;;  %661 = vmatpush.msrb.mxu2 %v521_v12  ;;  %v756_v10 = vld [vmem:[%s950_s2] ss:$0 sm:$0xff]  ;;  %s893_s2 = smov [#allocation10]  }
  0x7b   :  { %641 = vmatpush.msrb.mxu1 %v520_v11  ;;  %681 = vmatpush.msrb.mxu3 %v522_v13  ;;  %s733_s15 = sshll.u32 %s893_s2, 4  ;;  %s734_s15 = int_to_ptr.vmem [resolvable:$true] %s733_s15 }
  0x7c   :  { %622 = vmatpush.msrb.mxu0 %v511_v14  ;;  %662 = vmatpush.msrb.mxu2 %v513_v16 }
  0x7d   :  { %642 = vmatpush.msrb.mxu1 %v512_v15  ;;  %682 = vmatpush.msrb.mxu3 %v514_v17 }
  0x7e   :  { %623 = vmatpush.msrb.mxu0 %v503_v18  ;;  %663 = vmatpush.msrb.mxu2 %v505_v20 }
  0x7f   :  { %643 = vmatpush.msrb.mxu1 %v504_v19  ;;  %683 = vmatpush.msrb.mxu3 %v506_v21 }
  0x80   :  { %624 = vmatpush.msrb.mxu0 %v495_v22  ;;  %664 = vmatpush.msrb.mxu2 %v497_v24 }
  0x81   :  { %644 = vmatpush.msrb.mxu1 %v496_v23  ;;  %684 = vmatpush.msrb.mxu3 %v498_v25 }
  0x82   :  { %625 = vmatpush.msrb.mxu0 %v487_v26  ;;  %665 = vmatpush.msrb.mxu2 %v489_v28 }
  0x83   :  { %645 = vmatpush.msrb.mxu1 %v488_v27  ;;  %685 = vmatpush.msrb.mxu3 %v490_v29  ;;  %v523_v27 = vld [vmem:[#allocation8] sm:$0xff] }
  0x84   :  { %626 = vmatpush.msrb.mxu0 %v479_v30  ;;  %666 = vmatpush.msrb.mxu2 %v481_v32  ;;  %v526_v28 = vperm.slane %v523_v27, 1  ;;  %v527_v32 = vperm.slane %v523_v27, 2 }
  0x85   :  { %646 = vmatpush.msrb.mxu1 %v480_v31  ;;  %686 = vmatpush.msrb.mxu3 %v482_v33  ;;  %v528_v33 = vperm.slane %v523_v27, 3 }
  0x86   :  { %627 = vmatpush.msrb.mxu0 %v471_v34  ;;  %667 = vmatpush.msrb.mxu2 %v473_v36  ;;  %v525_v34 = vperm.slane %v523_v27, 0 }
  0x87   :  { %647 = vmatpush.msrb.mxu1 %v472_v35  ;;  %687 = vmatpush.msrb.mxu3 %v474_v37 }
  0x88   :  { %628 = vmatpush.msrb.mxu0 %v463_v38  ;;  %668 = vmatpush.msrb.mxu2 %v465_v40  ;;  %v530_v40 = vperm.slane %v523_v27, 5 }
  0x89   :  { %648 = vmatpush.msrb.mxu1 %v464_v39  ;;  %688 = vmatpush.msrb.mxu3 %v466_v41 }
  0x8a   :  { %629 = vmatpush.msrb.mxu0 %v455_v42  ;;  %669 = vmatpush.msrb.mxu2 %v457_v44 }
  0x8b   :  { %649 = vmatpush.msrb.mxu1 %v456_v43  ;;  %689 = vmatpush.msrb.mxu3 %v458_v45  ;;  %v531_v45 = vperm.slane %v523_v27, 6 }
  0x8c   :  { %630 = vmatpush.msrb.mxu0 %v447_v46  ;;  %670 = vmatpush.msrb.mxu2 %v449_v48 }
  0x8d   :  { %650 = vmatpush.msrb.mxu1 %v448_v47  ;;  %690 = vmatpush.msrb.mxu3 %v450_v49  ;;  %v532_v49 = vperm.slane %v523_v27, 7 }
  0x8e   :  { %631 = vmatpush.msrb.mxu0 %v439_v50  ;;  %671 = vmatpush.msrb.mxu2 %v441_v52 }
  0x8f   :  { %651 = vmatpush.msrb.mxu1 %v440_v51  ;;  %691 = vmatpush.msrb.mxu3 %v442_v53  ;;  %v529_v51 = vperm.slane %v523_v27, 4 }
  0x90   :  { %632 = vmatpush.msrb.mxu0 %v431_v54  ;;  %672 = vmatpush.msrb.mxu2 %v433_v56 }
  0x91   :  { %652 = vmatpush.msrb.mxu1 %v432_v55  ;;  %692 = vmatpush.msrb.mxu3 %v434_v57 }
  0x92   :  { %633 = vmatpush.msrb.mxu0 %v423_v58  ;;  %673 = vmatpush.msrb.mxu2 %v425_v60 }
  0x93   :  { %653 = vmatpush.msrb.mxu1 %v424_v59  ;;  %693 = vmatpush.msrb.mxu3 %v426_v61 }
  0x94   :  { %634 = vmatpush.msrb.mxu0 %v415_v62  ;;  %674 = vmatpush.msrb.mxu2 %v417_v0 }
  0x95   :  { %654 = vmatpush.msrb.mxu1 %v416_v63  ;;  %694 = vmatpush.msrb.mxu3 %v418_v1 }
  0x96   :  { %635 = vmatpush.msrb.mxu0 %v407_v2  ;;  %675 = vmatpush.msrb.mxu2 %v409_v4 }
  0x97   :  { %655 = vmatpush.msrb.mxu1 %v408_v3  ;;  %695 = vmatpush.msrb.mxu3 %v410_v5 }
  0x98   :  { %636 = vmatpush.msrb.mxu0 %v399_v6  ;;  %676 = vmatpush.msrb.mxu2 %v401_v8 }
  0x99   :  { %656 = vmatpush.msrb.mxu1 %v400_v7  ;;  %696 = vmatpush.msrb.mxu3 %v402_v9 }
  0xcb   :  { %v252_v11 = vpop.f32.mrf.mxu0 }
  0xcc   :  { %v253_v12 = vadd.f32 %v756_v10, %v252_v11 }
  0xce   :  { %v272_v13 = vpop.f32.mrf.mxu1 }
  0xcf   :  { %v273_v14 = vadd.f32 %v272_v13, %v253_v12  ;;  %v292_v15 = vpop.f32.mrf.mxu2 }
  0xd1   :  { %v293_v16 = vadd.f32 %v292_v15, %v273_v14 }
  0xd2   :  { %v312_v17 = vpop.f32.mrf.mxu3 }
  0xd3   :  { %v313_v18 = vadd.f32 %v312_v17, %v293_v16 }
  0xd5   :  { %v332_v19 = vpop.f32.mrf.mxu0 }
  0xd6   :  { %v333_v20 = vadd.f32 %v332_v19, %v313_v18 }
  0xd7   :  { %v352_v21 = vpop.f32.mrf.mxu1 }
  0xd8   :  { %v353_v22 = vadd.f32 %v352_v21, %v333_v20 }
  0xd9   :  { %v372_v23 = vpop.f32.mrf.mxu2 }
  0xda   :  { %v373_v24 = vadd.f32 %v372_v23, %v353_v22 }
  0xdb   :  { %v392_v25 = vpop.f32.mrf.mxu3 }
  0xdc   :  { %v393_v26 = vadd.f32 %v392_v25, %v373_v24 }
  0xde   :  { %557 = vmatmul.f32.vlgmr.msra.gmra.mxu0 %v393_v26  ;;  %577 = vmatmul.f32.vlgmr.msra.gmra.mxu1 %v393_v26 }
  0xdf   :  { %597 = vmatmul.f32.vlgmr.msra.gmra.mxu2 %v393_v26  ;;  %617 = vmatmul.f32.vlgmr.msra.gmra.mxu3 %v393_v26 }
  0xe6   :  { %637 = vmatmul.f32.vlgmr.msrb.gmra.mxu0 %v393_v26  ;;  %657 = vmatmul.f32.vlgmr.msrb.gmra.mxu1 %v393_v26 }
  0xe7   :  { %677 = vmatmul.f32.vlgmr.msrb.gmra.mxu2 %v393_v26  ;;  %697 = vmatmul.f32.vlgmr.msrb.gmra.mxu3 %v393_v26 }
 0x15b   :  { %v578_v29 = vpop.f32.mrf.mxu1  ;;  %v558_v30 = vpop.f32.mrf.mxu0 }
 0x15c   :  { %v579_v31 = vadd.f32 %v578_v29, %v526_v28  ;;  %v559_v42 = vadd.f32 %v558_v30, %v525_v34 }
 0x15e   :  { %v709_v37 = vrot.slane %v579_v31, 6 }
 0x160   :  { %v716_v46 = vsel %vm715_vm0, %v559_v42, %v709_v37 }
 0x162   :  { %v598_v35 = vpop.f32.mrf.mxu2  ;;  %v618_v36 = vpop.f32.mrf.mxu3 }
 0x163   :  { %v599_v38 = vadd.f32 %v598_v35, %v527_v32  ;;  %v619_v39 = vadd.f32 %v618_v36, %v528_v33  ;;  %v658_v41 = vpop.f32.mrf.mxu1  ;;  %v638_v52 = vpop.f32.mrf.mxu0 }
 0x164   :  { %v659_v48 = vadd.f32 %v658_v41, %v530_v40  ;;  %v639_v58 = vadd.f32 %v638_v52, %v529_v51 }
 0x165   :  { %v710_v43 = vrot.slane %v599_v38, 4  ;;  %v711_v44 = vrot.slane %v619_v39, 2 }
 0x166   :  { %v712_v55 = vrot.slane %v659_v48, 6 }
 0x167   :  { %v718_v47 = vsel %vm717_vm1, %v710_v43, %v711_v44 }
 0x168   :  { %v720_v50 = vsel %vm719_vm2, %v716_v46, %v718_v47  ;;  %v721_v61 = vsel %vm715_vm0, %v639_v58, %v712_v55 }
 0x169   :  { %726 = vst [vmem:[#allocation10] sm:$0xff] %v720_v50 }
 0x16a   :  { %v678_v53 = vpop.f32.mrf.mxu2  ;;  %v698_v54 = vpop.f32.mrf.mxu3 }
 0x16b   :  { %v679_v56 = vadd.f32 %v678_v53, %v531_v45  ;;  %v699_v57 = vadd.f32 %v698_v54, %v532_v49 }
 0x16d   :  { %v713_v59 = vrot.slane %v679_v56, 4  ;;  %v714_v60 = vrot.slane %v699_v57, 2 }
 0x16f   :  { %v722_v62 = vsel %vm717_vm1, %v713_v59, %v714_v60 }
 0x170   :  { %v723_v63 = vsel %vm719_vm2, %v721_v61, %v722_v62 }
 0x171   :  { %727 = vst [vmem:[#allocation10 + $0x8] sm:$0xff] %v723_v63 }
 0x172   :  { %738 = dma.vmem_to_hbm [thread:$0]  %s734_s15, 256, %s736_s18, [#allocation4]  }
 0x173   :  { %883 = dma.done.wait [#allocation4], 256  }
 0x174   :  { %884 = vsyncadd [#allocation4], 4294967040 }
 0x175   :  { %743 = vsyncpa [#allocation3], 1 }
 0x176   :  { %744 = vsyncpa [#allocation6], 1 }
 0x177   :  { %745 = vsyncpa [#allocation9], 1 }
 0x178   :  { %746 = vsyncpa [#allocation4], 1 }

</bundles_post_ra>
